<compile_context>
chip_gen: v6e
topology: v6e:2x2x1
jax: 0.10.0
libtpu: 0.0.40
codegen_flags: <defaults>
</compile_context>

<pallas_src>
import jax
import jax.numpy as jnp
from jax.experimental import pallas as pl
from jax.experimental.pallas import tpu as pltpu


def _swish(x):
    return x * jax.nn.sigmoid(x)


def _round_up(x, m):
    return ((x + m - 1) // m) * m


def _make_kernel(h0, h1, d_out):
    """Build the fused 3-layer MLP kernel with static bias offsets baked in.

    h0_  = swish(W0 @ x^T + b0)
    h1_  = swish(W1 @ h0_ + b1)
    y^T  =       W2 @ h1_ + b2        (no activation after the last Linear)
    """

    def kernel(xT_ref, w0_ref, w1_ref, w2_ref, b_ref, oT_ref):
        xT = xT_ref[...]

        # Static slices of the concatenated bias buffer (f32 column vectors
        # that broadcast over the batch/lane axis).
        b0 = b_ref[0:h0, :]
        b1 = b_ref[h0:h0 + h1, :]
        b2 = b_ref[h0 + h1:h0 + h1 + d_out, :]

        h = jnp.dot(w0_ref[...], xT, preferred_element_type=jnp.float32) + b0
        h = _swish(h)

        h = jnp.dot(w1_ref[...], h.astype(w1_ref.dtype),
                    preferred_element_type=jnp.float32) + b1
        h = _swish(h)

        y = jnp.dot(w2_ref[...], h.astype(w2_ref.dtype),
                    preferred_element_type=jnp.float32) + b2
        oT_ref[...] = y.astype(oT_ref.dtype)

    return kernel


def pod_net_apply_T(xT, params, *, batch_tile=32768, core_parallel=False,
                    vmem_limit_bytes=32 * 1024 * 1024):
    """Feature-major fast path: xT [d_in, B] -> y^T [d_out, B].

    No host-side transposes or pads.  Ragged B is handled by the partial
    trailing block (out-of-bounds lanes carry garbage, are lane-local, and are
    discarded on output writeback).  For batch_tile > ~32768 with f32 I/O,
    raise vmem_limit_bytes (but keep headroom on v7x's 64 MiB VMEM).
    """
    (w0, b0), (w1, b1), (w2, b2) = params
    d_in, B = xT.shape
    h0, h1, d_out = w0.shape[0], w1.shape[0], w2.shape[0]
    assert w0.shape[1] == d_in and w1.shape[1] == h0 and w2.shape[1] == h1

    # ---- lane-aligned batch tile --------------------------------------------
    tile_cap = (B // 128) * 128          # largest 128-multiple <= B
    if tile_cap == 0:
        # Tiny batch: a single block equal to the full array (no pad needed).
        tile = B
    else:
        tile = min(_round_up(batch_tile, 128), tile_cap)
        if B >= 1024:
            # v7x has 2 TensorCores: keep >= 2 grid steps on the batch axis so
            # core-level parallelism has something to shard.
            tile = min(tile, _round_up(pl.cdiv(B, 2), 128))
    grid = (pl.cdiv(B, tile),)

    # Concatenated biases: one grid-invariant operand, added in f32 so the
    # accumulator stays exact regardless of parameter storage dtype.
    bcat = jnp.concatenate([b0, b1, b2]).reshape(h0 + h1 + d_out, 1)
    bcat = bcat.astype(jnp.float32)

    itemsize = jnp.dtype(xT.dtype).itemsize
    flops = 2 * B * (d_in * h0 + h0 * h1 + h1 * d_out)
    transcendentals = B * (h0 + h1)      # one exp per hidden swish element
    w_bytes = sum(int(a.size) * a.dtype.itemsize for a in (w0, w1, w2))
    bytes_accessed = itemsize * (d_in + d_out) * B + w_bytes + int(bcat.size) * 4

    def x_map(i):        # batch tiles march along the lane axis
        return (0, i)

    def const_map(i):    # grid-invariant operands: same block index every
        return (0, 0)    # step, so the pipeline keeps them VMEM-resident.

    if core_parallel:
        dim_sem = (pltpu.CORE_PARALLEL,)   # explicit cross-TensorCore sharding (v7x)
    else:
        dim_sem = ("parallel",)            # safe no-op on single-TC v5e/v6e

    kernel = _make_kernel(h0, h1, d_out)

    yT = pl.pallas_call(
        kernel,
        out_shape=jax.ShapeDtypeStruct((d_out, B), xT.dtype),
        grid_spec=pltpu.PrefetchScalarGridSpec(
            num_scalar_prefetch=0,
            grid=grid,
            in_specs=[
                pl.BlockSpec((d_in, tile), x_map),
                pl.BlockSpec(w0.shape, const_map),
                pl.BlockSpec(w1.shape, const_map),
                pl.BlockSpec(w2.shape, const_map),
                pl.BlockSpec(bcat.shape, const_map),
            ],
            out_specs=pl.BlockSpec((d_out, tile), x_map),
        ),
        compiler_params=pltpu.CompilerParams(
            dimension_semantics=dim_sem,
            vmem_limit_bytes=vmem_limit_bytes,
        ),
        cost_estimate=pl.CostEstimate(
            flops=int(flops),
            transcendentals=int(transcendentals),
            bytes_accessed=int(bytes_accessed),
        ),
    )(xT, w0, w1, w2, bcat)

    return yT


def pod_net_forward(x, params, **kwargs):
    """PyTorch-layout convenience wrapper: x [B, d_in] -> y [B, d_out].

    NOTE: the two transposes below are separate XLA copies (one extra HBM pass
    over x and over y).  Large-batch pipelines should stay feature-major
    end-to-end and call pod_net_apply_T directly.
    """
    return pod_net_apply_T(x.T, params, **kwargs).T


def init_pod_net_params(key, layers, dtype=jnp.float32):
    """Deterministic init matching nn.Linear shapes (W: [out, in], b: [out])."""
    params = []
    for i in range(len(layers) - 1):
        key, kw, kb = jax.random.split(key, 3)
        fan_in = layers[i]
        bound = float(fan_in) ** -0.5
        w = jax.random.uniform(kw, (layers[i + 1], layers[i]),
                               minval=-bound, maxval=bound,
                               dtype=jnp.float32).astype(dtype)
        b = jax.random.uniform(kb, (layers[i + 1],),
                               minval=-bound, maxval=bound,
                               dtype=jnp.float32).astype(dtype)
        params.append((w, b))
    return params


def pod_net_reference(x, params):
    """Pure-JAX reference of the same forward pass (PyTorch orientation)."""
    n = len(params)
    h = x
    for i, (w, b) in enumerate(params):
        h = h @ w.T + b[None, :]
        if i != n - 1:
            h = _swish(h)
    return h


if __name__ == "__main__":
    # POD_Net(layers=[16, 32, 32, 8])
    layers = [16, 32, 32, 8]
    key = jax.random.PRNGKey(0)
    params_f32 = init_pod_net_params(key, layers, dtype=jnp.float32)

    # ---- Test 1: f32, feature-major end-to-end, multi-step grid (3 x 512) ---
    key, kx = jax.random.split(key)
    B1 = 1536
    xT1 = jax.random.normal(kx, (layers[0], B1), dtype=jnp.float32)
    yT1 = jax.block_until_ready(pod_net_apply_T(xT1, params_f32, batch_tile=512))
    ref1 = pod_net_reference(xT1.T, params_f32)
    assert yT1.shape == (layers[-1], B1)
    assert jnp.allclose(yT1.T, ref1, atol=2e-3, rtol=2e-3), "f32 mismatch"

    # ---- Test 2: f32, ragged batch (partial trailing block, no host pad) ----
    key, kx = jax.random.split(key)
    B2 = 200
    xT2 = jax.random.normal(kx, (layers[0], B2), dtype=jnp.float32)
    yT2 = jax.block_until_ready(pod_net_apply_T(xT2, params_f32, batch_tile=128))
    ref2 = pod_net_reference(xT2.T, params_f32)
    assert yT2.shape == (layers[-1], B2)
    assert jnp.allclose(yT2.T, ref2, atol=2e-3, rtol=2e-3), "ragged mismatch"

    # ---- Test 3: bf16 storage via the PyTorch row-major wrapper, tiny batch -
    key, kx = jax.random.split(key)
    B3 = 16
    x_bf16 = jax.random.normal(kx, (B3, layers[0]), dtype=jnp.float32)
    x_bf16 = x_bf16.astype(jnp.bfloat16)
    params_bf16 = [(w.astype(jnp.bfloat16), b.astype(jnp.bfloat16))
                   for w, b in params_f32]
    y_bf16 = jax.block_until_ready(pod_net_forward(x_bf16, params_bf16))
    ref3 = pod_net_reference(
        x_bf16.astype(jnp.float32),
        [(w.astype(jnp.float32), b.astype(jnp.float32)) for w, b in params_bf16])
    assert y_bf16.shape == (B3, layers[-1])
    # bf16 inter-layer activation quantization differs from the f32 reference;
    # widen tolerance accordingly (per review: not a bug).
    assert jnp.allclose(y_bf16.astype(jnp.float32), ref3,
                        atol=5e-2, rtol=5e-2), "bf16 mismatch"

    # TODO(synk): grad / u_net / forward / loss_NN / loss_PINN are `pass` stubs
    # in the source module; only the `unet` Sequential MLP forward has defined
    # semantics and is implemented here.
    print("KERNEL_OK")
</pallas_src>

<mosaic_0001>
module attributes {stable_mosaic.version = 11 : i64} {
  func.func @kernel(%arg0: i32, %arg1: memref<16x512xf32, #tpu.memory_space<vmem>>, %arg2: memref<32x16xf32, #tpu.memory_space<vmem>>, %arg3: memref<32x32xf32, #tpu.memory_space<vmem>>, %arg4: memref<8x32xf32, #tpu.memory_space<vmem>>, %arg5: memref<72x1xf32, #tpu.memory_space<vmem>>, %arg6: memref<8x512xf32, #tpu.memory_space<vmem>>) attributes {dimension_semantics = [#tpu.dimension_semantics<parallel>], iteration_bounds = array<i64: 3>, scalar_prefetch = 0 : i64, scratch_operands = 0 : i64, tpu.core_type = #tpu.core_type<tc>, window_params = [{transform_indices = @transform_0, window_bounds = array<i64: 16, 512>}, {pipeline_mode = #tpu.pipeline_mode<synchronous>, transform_indices = @transform_1, window_bounds = array<i64: 32, 16>}, {pipeline_mode = #tpu.pipeline_mode<synchronous>, transform_indices = @transform_2, window_bounds = array<i64: 32, 32>}, {pipeline_mode = #tpu.pipeline_mode<synchronous>, transform_indices = @transform_3, window_bounds = array<i64: 8, 32>}, {pipeline_mode = #tpu.pipeline_mode<synchronous>, transform_indices = @transform_4, window_bounds = array<i64: 72, 1>}, {transform_indices = @transform_5, window_bounds = array<i64: 8, 512>}]} {
    %c0 = arith.constant 0 : index
    %c0_0 = arith.constant 0 : index
    %0 = vector.load %arg1[%c0, %c0_0] : memref<16x512xf32, #tpu.memory_space<vmem>>, vector<16x512xf32>
    %c0_1 = arith.constant 0 : index
    %c0_2 = arith.constant 0 : index
    %1 = vector.load %arg5[%c0_1, %c0_2] : memref<72x1xf32, #tpu.memory_space<vmem>>, vector<32x1xf32>
    %c32 = arith.constant 32 : index
    %c0_3 = arith.constant 0 : index
    %2 = vector.load %arg5[%c32, %c0_3] : memref<72x1xf32, #tpu.memory_space<vmem>>, vector<32x1xf32>
    %c64 = arith.constant 64 : index
    %c0_4 = arith.constant 0 : index
    %3 = vector.load %arg5[%c64, %c0_4] : memref<72x1xf32, #tpu.memory_space<vmem>>, vector<8x1xf32>
    %c0_5 = arith.constant 0 : index
    %c0_6 = arith.constant 0 : index
    %4 = vector.load %arg2[%c0_5, %c0_6] : memref<32x16xf32, #tpu.memory_space<vmem>>, vector<32x16xf32>
    %cst = arith.constant dense<0.000000e+00> : vector<32x512xf32>
    %5 = tpu.matmul %4, %0, %cst {dimension_numbers = #tpu.dot_dimension_numbers<[1], [0], [0], [1], [0, 0, 1, 1], [], []>} : vector<32x16xf32>, vector<16x512xf32>, vector<32x512xf32> -> vector<32x512xf32>
    %6 = vector.broadcast %1 : vector<32x1xf32> to vector<32x512xf32>
    %7 = arith.addf %5, %6 : vector<32x512xf32>
    %8 = arith.negf %7 : vector<32x512xf32>
    %9 = math.exp %8 : vector<32x512xf32>
    %cst_7 = arith.constant 1.000000e+00 : f32
    %10 = vector.broadcast %cst_7 : f32 to vector<32x512xf32>
    %11 = arith.addf %10, %9 : vector<32x512xf32>
    %12 = arith.divf %10, %11 : vector<32x512xf32>
    %13 = arith.mulf %7, %12 : vector<32x512xf32>
    %c0_8 = arith.constant 0 : index
    %c0_9 = arith.constant 0 : index
    %14 = vector.load %arg3[%c0_8, %c0_9] : memref<32x32xf32, #tpu.memory_space<vmem>>, vector<32x32xf32>
    %cst_10 = arith.constant dense<0.000000e+00> : vector<32x512xf32>
    %15 = tpu.matmul %14, %13, %cst_10 {dimension_numbers = #tpu.dot_dimension_numbers<[1], [0], [0], [1], [0, 0, 1, 1], [], []>} : vector<32x32xf32>, vector<32x512xf32>, vector<32x512xf32> -> vector<32x512xf32>
    %16 = vector.broadcast %2 : vector<32x1xf32> to vector<32x512xf32>
    %17 = arith.addf %15, %16 : vector<32x512xf32>
    %18 = arith.negf %17 : vector<32x512xf32>
    %19 = math.exp %18 : vector<32x512xf32>
    %cst_11 = arith.constant 1.000000e+00 : f32
    %20 = vector.broadcast %cst_11 : f32 to vector<32x512xf32>
    %21 = arith.addf %20, %19 : vector<32x512xf32>
    %22 = arith.divf %20, %21 : vector<32x512xf32>
    %23 = arith.mulf %17, %22 : vector<32x512xf32>
    %c0_12 = arith.constant 0 : index
    %c0_13 = arith.constant 0 : index
    %24 = vector.load %arg4[%c0_12, %c0_13] : memref<8x32xf32, #tpu.memory_space<vmem>>, vector<8x32xf32>
    %cst_14 = arith.constant dense<0.000000e+00> : vector<8x512xf32>
    %25 = tpu.matmul %24, %23, %cst_14 {dimension_numbers = #tpu.dot_dimension_numbers<[1], [0], [0], [1], [0, 0, 1, 1], [], []>} : vector<8x32xf32>, vector<32x512xf32>, vector<8x512xf32> -> vector<8x512xf32>
    %26 = vector.broadcast %3 : vector<8x1xf32> to vector<8x512xf32>
    %27 = arith.addf %25, %26 : vector<8x512xf32>
    %c0_15 = arith.constant 0 : index
    %c0_16 = arith.constant 0 : index
    %28 = vector.load %arg6[%c0_15, %c0_16] : memref<8x512xf32, #tpu.memory_space<vmem>>, vector<8x512xf32>
    tpu.vector_store %arg6[%c0_15, %c0_16], %27 {strides = array<i32>} : memref<8x512xf32, #tpu.memory_space<vmem>>, vector<8x512xf32>,
    return
  }
  func.func @transform_0(%arg0: i32) -> (i32, i32) {
    %c0_i32 = arith.constant 0 : i32
    %c0_i32_0 = arith.constant 0 : i32
    return %c0_i32, %arg0 : i32, i32
  }
  func.func @transform_1(%arg0: i32) -> (i32, i32) {
    %c0_i32 = arith.constant 0 : i32
    %c0_i32_0 = arith.constant 0 : i32
    %c0_i32_1 = arith.constant 0 : i32
    return %c0_i32, %c0_i32_0 : i32, i32
  }
  func.func @transform_2(%arg0: i32) -> (i32, i32) {
    %c0_i32 = arith.constant 0 : i32
    %c0_i32_0 = arith.constant 0 : i32
    %c0_i32_1 = arith.constant 0 : i32
    return %c0_i32, %c0_i32_0 : i32, i32
  }
  func.func @transform_3(%arg0: i32) -> (i32, i32) {
    %c0_i32 = arith.constant 0 : i32
    %c0_i32_0 = arith.constant 0 : i32
    %c0_i32_1 = arith.constant 0 : i32
    return %c0_i32, %c0_i32_0 : i32, i32
  }
  func.func @transform_4(%arg0: i32) -> (i32, i32) {
    %c0_i32 = arith.constant 0 : i32
    %c0_i32_0 = arith.constant 0 : i32
    %c0_i32_1 = arith.constant 0 : i32
    return %c0_i32, %c0_i32_0 : i32, i32
  }
  func.func @transform_5(%arg0: i32) -> (i32, i32) {
    %c0_i32 = arith.constant 0 : i32
    %c0_i32_0 = arith.constant 0 : i32
    return %c0_i32, %arg0 : i32, i32
  }
}

</mosaic_0001>

<bundles_post_ra>
// kernel: tpu_custom_call.1
= control target key start
LH: loop header
LB: loop body
LE: loop exit
PB: predicated region body
PF: predicated region fallthrough
CT: control target
= control target key end

     0   :  { %10 = vsyncpa [#allocation3], 0  ;;  %s1899_s0 = inlined_call_operand.hbm [shape: f32[16,1536], index: 0, kind: input, shape index: {}]   ;;  %s1900_s1 = inlined_call_operand.vmem [shape: f32[32,16], index: 1, kind: input, shape index: {}]   ;;  %s1901_s2 = inlined_call_operand.vmem [shape: f32[32,32], index: 2, kind: input, shape index: {}]   ;;  %s1902_s3 = inlined_call_operand.vmem [shape: f32[8,32], index: 3, kind: input, shape index: {}]   ;;  %s1903_s4 = inlined_call_operand.vmem [shape: f32[72,1], index: 4, kind: input, shape index: {}]   ;;  %s1904_s5 = inlined_call_operand.hbm [shape: f32[8,1536], index: 5, kind: output, shape index: {}]  }
   0x1   :  { %12 = vsyncpa [#allocation3 + $0x1], 0 }
   0x2   :  { %13 = vsyncpa [#allocation4], 0 }
   0x3   :  { %15 = vsyncpa [#allocation4 + $0x1], 0  ;;  %s1534_s18 = smov 0   ;;  %s1536_s19 = smov 0  }
   0x4   :  { %s1538_s20 = smov 0   ;;  %s1540_s21 = smov 0  }
   0x5 LB: > { %s1555_s22 = sadd.s32 4294967295, %s1495_s21   ;;  %s1156_s23 = sadd.s32 4294967294, %s1495_s21   ;;  %s1495_s21 = sphi %s1540_s21, %s1919_s21   ;;  %s1491_s20 = sphi %s1538_s20, %s1918_s20   ;;  %s1487_s19 = sphi %s1536_s19, %s1917_s19   ;;  %s1483_s18 = sphi %s1534_s18, %s1916_s18  }
   0x6   : > { %s1559_s24 = sadd.s32 1, %s1495_s21   ;;  %s28_s25 = sadd.s32 1, %s1491_s20 }
   0x7   : > { %s25_s26 = ssub.s32 %s1495_s21, %s1559_s24  ;;  %p35_p0 = scmp.ne.s32.totalorder %s1491_s20, %s1487_s19 }
   0x8   : > { %p26_p1 = scmp.eq.s32.totalorder %s25_s26, 0  ;;  %p36_p2 = scmp.eq.s32.totalorder %s1495_s21, 0 }
   0x9   : > { %p41_p3 = scmp.ne.s32.totalorder %s1487_s19, %s1483_s18  ;;  %p42_p4 = scmp.eq.s32.totalorder %s1555_s22, 0 }
   0xa   : > { %s1571_s27 = scalar_select %p26_p1, %s1491_s20, %s28_s25  }
   0xb   : > { %p1573_p5 = por %p36_p2, %p35_p0  ;;  %p1577_p6 = por %p42_p4, %p41_p3 }
   0xc   : > { %p149_p7 = scmp.eq.s32.totalorder %s1555_s22, 2  ;;  %p155_p8 = scmp.eq.s32.totalorder %s1156_s23, 2 }
   0xd   : > { %s1908_s29 = scalar_select %p1577_p6, 1, 0 }
   0xe   : > { %p1234_p9 = scmp.lt.s32.totalorder %s1495_s21, 3  ;;  %p1583_p10 = por %p149_p7, %p35_p0 }
   0xf   : > { %p1587_p11 = por %p155_p8, %p41_p3  ;;  %s187_s7 = sand.u32 1, %s1491_s20  }
  0x10   : > { %s1909_s30 = scalar_select %p1583_p10, 1, 0 }
  0x11   : > { %s1910_s6 = scalar_select %p1587_p11, 1, 0 }
  0x12   : > { %s1220_s8 = sshll.u32 %s1495_s21, 9  ;;  %s1159_s9 = sshll.u32 %s187_s7, 6 }
  0x13   : > { %s1596_s12 = scalar_lea.hbm %s1899_s0, %s1220_s8  ;;  %s191_s13 = scalar_lea.vmem [#allocation2], %s1159_s9 }
  0x14   : > { %s198_s14 = sshll.u32 %s191_s13, 4  ;;  %p1600_p12 = pnand %p1234_p9, %p1573_p5  ;;  %s1604_s14 = int_to_ptr.vmem [resolvable:$true] %s198_s14 }
  0x15   : > { %s1607_s16 = scalar_lea.sflag [#allocation3], %s187_s7  ;;  %s1403_s17 = scalar_lea.hbm %s1596_s12, 1024 }
  0x16   : > { %p1404_p0 = scmp.ne.s32.totalorder %s1596_s12, %s1403_s17  ;;  %p1405_p1 = pneg %p1600_p12 }
  0x17   : > { %s1408_s26 = scalar_lea.hbm %s1899_s0, 3072  ;;  %p1409_p4 = scmp.lt.s32.totalorder %s1596_s12, %s1899_s0 }
  0x18   : > { %p1406_p2 = pnand %p1405_p1, %p1404_p0  ;;  %p1410_p5 = scmp.lt.s32.totalorder %s1408_s26, %s1403_s17 }
  0x1a   : > { %p1407_p3 = pneg %p1406_p2  ;;  %p1411_p7 = por %p1410_p5, %p1409_p4 }
  0x1c   : > { %p1412_p8 = pnand %p1411_p7, %p1407_p3 }
  0x1e   : > { %1415 = shalt.err (!%p1412_p8)
}
  0x1f   : > { %s1416_s7 = scalar_lea.vmem %s1604_s14, 1024  ;;  %s1497_s9 = smov [#allocation2]  }
  0x20   : > { %p1417_p9 = scmp.ne.s32.totalorder %s1604_s14, %s1416_s7  ;;  %s1421_s10 = sshll.u32 %s1497_s9, 4  ;;  %s1422_s10 = int_to_ptr.vmem [resolvable:$false] %s1421_s10 }
  0x21   : > { %s1423_s11 = scalar_lea.vmem %s1422_s10, 2048  ;;  %p1424_p2 = scmp.lt.s32.totalorder %s1604_s14, %s1422_s10 }
  0x22   : > { %p1419_p13 = pnand %p1417_p9, %p1405_p1  ;;  %p1425_p11 = scmp.lt.s32.totalorder %s1423_s11, %s1416_s7 }
  0x24   : > { %p1420_p0 = pneg %p1419_p13  ;;  %p1426_p10 = por %p1425_p11, %p1424_p2 }
  0x26   : > { %p1427_p6 = pnand %p1426_p10, %p1420_p0 }
  0x28   : > { %1430 = shalt.err (!%p1427_p6)
}
  0x29   : > { %s1498_s13 = smov 1536   ;;  %s1499_s17 = smov 512  }
  0x2a   : > { %s1500_s23 = smov 32   ;;  %p206_p13 = scmp.lt.s32.totalorder %s1495_s21, 4 }
  0x2b   : > { %1229 = dma.hbm_to_vmem [thread:$0]  (!%p1600_p12), %s1596_s12, 1024, %s1604_s14, %s1607_s16, %s1498_s13, %s1499_s17, %s1500_s23  }
  0x2c   : > { %p1912_p1 = scmp.ge.s32.totalorder %s1495_s21, 1 }
  0x2e   : > { %p207_p3 = pnand %p1912_p1, %p206_p13 }
  0x2f   : > { %s1632_s25 = sand.u32 (!%p207_p3), 1, %s1487_s19   ;;  %p1913_p6 = scmp.ne.s32.totalorder (!%p207_p3), %s1908_s29, 0 }
  0x30   : > { %210 = sbr.rel (%p207_p3) target bundleno = 774 (0x306), region = 40  ;;  %s1163_s26 = sshll.u32 (!%p207_p3), %s1632_s25, 6 }
  0x31   : > { %s213_s28 = scalar_lea.sflag (!%p207_p3), [#allocation3], %s1632_s25  ;;  %s216_s8 = scalar_lea.vmem (!%p207_p3), [#allocation2], %s1163_s26 }
  0x35   : > { %1474 = dma.done.wait (%p1913_p6), %s213_s28, 1024  }
  0x36   : > { %1476 = vsyncadd (%p1913_p6), %s213_s28, 4294966272  ;;  %v1501_v0 = vmov 0.0   ;;  %v1502_v1 = vmov 0   ;;  %v250_v2 = vld [vmem:[%s216_s8 + $0x28] sm:$0xff]  ;;  %v252_v3 = vld [vmem:[%s216_s8 + $0x38] sm:$0xff]  ;;  %vm286_vm0 = vcmask 130048  }
  0x37   : > { %363 = vmatprep.mubr.f32.mxu0 %v1501_v0  ;;  %452 = vmatprep.mubr.f32.mxu1 %v1501_v0  ;;  %v249_v4 = vld [vmem:[%s216_s8 + $0x20] sm:$0xff]  ;;  %v251_v5 = vld [vmem:[%s216_s8 + $0x30] sm:$0xff]  ;;  %v246_v6 = vld [vmem:[%s216_s8 + $0x8] sm:$0xff]  ;;  %vm613_vm1 = vcmask 261120   ;;  %s1164_s9 = sshll.u32 %s1632_s25, 5  ;;  %s1221_s10 = sshll.u32 %s1555_s22, 9 }
  0x38   : > { %1274 = vset.pattern.permute.xlu1 %v1502_v1  ;;  %1273 = vset.pattern.permute.xlu0 %v1502_v1  ;;  %v248_v7 = vld [vmem:[%s216_s8 + $0x18] sm:$0xff]  ;;  %v245_v8 = vld [vmem:[%s216_s8] sm:$0xff]  ;;  %v247_v9 = vld [vmem:[%s216_s8 + $0x10] sm:$0xff]  ;;  %s242_s11 = scalar_lea.vmem [#allocation5], %s1164_s9  ;;  %s1863_s26 = scalar_lea.hbm %s1904_s5, %s1221_s10 }
  0x39   : > { %327 = vmatprep.subr.mxu0 %v250_v2  ;;  %416 = vmatprep.subr.mxu1 %v252_v3  ;;  %v262_v10 = vld [vmem:[%s1900_s1] sm:$0xff]  ;;  %v256_v11 = vld [vmem:[%s1903_s4 + $0x18] sm:$0xff]  ;;  %v254_v12 = vld [vmem:[%s1903_s4 + $0x8] sm:$0xff]  ;;  %s1086_s13 = sshll.u32 %s242_s11, 4  ;;  %s1072_s28 = scalar_lea.sflag [#allocation4], %s1632_s25  ;;  %s1087_s13 = int_to_ptr.vmem [resolvable:$true] %s1086_s13 }
  0x3a   : > { %328 = vmatpush1.msra.mxu0 %v249_v4  ;;  %417 = vmatpush1.msra.mxu1 %v251_v5  ;;  %v263_v13 = vld [vmem:[%s1900_s1 + $0x8] sm:$0xff]  ;;  %v255_v14 = vld [vmem:[%s1903_s4 + $0x10] sm:$0xff]  ;;  %v253_v15 = vld [vmem:[%s1903_s4] sm:$0xff]  ;;  %s1431_s22 = scalar_lea.vmem %s1087_s13, 512  ;;  %p1914_p11 = scmp.ne.s32.totalorder %s1909_s30, 0 }
  0x3b   : > { %329 = vmatprep.subr.mxu0 %v246_v6  ;;  %418 = vmatprep.subr.mxu1 %v248_v7  ;;  %v264_v16 = vld [vmem:[%s1900_s1 + $0x10] sm:$0xff]  ;;  %v260_v17 = vld [vmem:[%s1903_s4 + $0x38] sm:$0xff]  ;;  %v258_v20 = vld [vmem:[%s1903_s4 + $0x28] sm:$0xff]  ;;  %p1432_p10 = scmp.ne.s32.totalorder %s1087_s13, %s1431_s22  ;;  %s1503_s8 = smov [#allocation5]  }
  0x3c   : > { %330 = vmatpush1.msra.mxu0 %v245_v8  ;;  %419 = vmatpush1.msra.mxu1 %v247_v9  ;;  %v259_v18 = vld [vmem:[%s1903_s4 + $0x30] sm:$0xff]  ;;  %v265_v19 = vld [vmem:[%s1900_s1 + $0x18] sm:$0xff]  ;;  %v257_v21 = vld [vmem:[%s1903_s4 + $0x20] sm:$0xff]  ;;  %s1435_s29 = sshll.u32 %s1503_s8, 4  ;;  %s1436_s29 = int_to_ptr.vmem [resolvable:$false] %s1435_s29 }
  0x3d   : > { %1165 = vmatmul.mubr.msk.f32.vlgmr.msra.gmra.mxu0 %vm286_vm0, %v262_v10  ;;  %1169 = vmatmul.mubr.msk.f32.vlgmr.msra.gmra.mxu1 %vm286_vm0, %v262_v10  ;;  %v261_v22 = vld [vmem:[%s1903_s4 + $0x40] sm:$0xff]  ;;  %p1433_p12 = pnand %p1432_p10, %p1914_p11  ;;  %s1437_s12 = scalar_lea.vmem %s1436_s29, 1024 }
  0x3e   : > { %369 = vmatprep.mubr.f32.mxu0 %v1501_v0  ;;  %458 = vmatprep.mubr.f32.mxu1 %v1501_v0  ;;  %p1438_p5 = scmp.lt.s32.totalorder %s1087_s13, %s1436_s29  ;;  %p1439_p7 = scmp.lt.s32.totalorder %s1437_s12, %s1431_s22 }
  0x3f   : > { %283 = vperm.xlu0 %1273, %v256_v11   ;;  %273 = vperm.xlu1 %1274, %v254_v12   ;;  %p1434_p4 = pneg %p1433_p12 }
  0x40   : > { %p1440_p8 = por %p1439_p7, %p1438_p5 }
  0x41   : > { %1166 = vmatmul.mubr.msk.f32.gmra.mxu0 %vm286_vm0, %v263_v13  ;;  %1170 = vmatmul.mubr.msk.f32.gmra.mxu1 %vm286_vm0, %v263_v13 }
  0x42   : > { %375 = vmatprep.mubr.f32.mxu0 %v1501_v0  ;;  %464 = vmatprep.mubr.f32.mxu1 %v1501_v0  ;;  %p1441_p9 = pnand %p1440_p8, %p1434_p4 }
  0x43   : > { %278 = vperm.xlu0 %1273, %v255_v14   ;;  %268 = vperm.xlu1 %1274, %v253_v15  }
  0x45   : > { %1167 = vmatmul.mubr.msk.f32.gmra.mxu0 %vm286_vm0, %v264_v16  ;;  %1171 = vmatmul.mubr.msk.f32.gmra.mxu1 %vm286_vm0, %v264_v16 }
  0x46   : > { %381 = vmatprep.mubr.f32.mxu0 %v1501_v0  ;;  %470 = vmatprep.mubr.f32.mxu1 %v1501_v0 }
  0x47   : > { %610 = vperm.xlu0 %1273, %v260_v17   ;;  %605 = vperm.xlu1 %1274, %v259_v18  }
  0x49   : > { %1168 = vmatmul.mubr.msk.f32.gmra.mxu0 %vm286_vm0, %v265_v19  ;;  %1172 = vmatmul.mubr.msk.f32.gmra.mxu1 %vm286_vm0, %v265_v19 }
  0x4a   : > { %690 = vmatprep.mubr.f32.mxu0 %v1501_v0  ;;  %779 = vmatprep.mubr.f32.mxu1 %v1501_v0 }
  0x4b   : > { %600 = vperm.xlu0 %1273, %v258_v20   ;;  %595 = vperm.xlu1 %1274, %v257_v21  }
  0x4f   : > { %919 = vperm.xlu0 %1273, %v261_v22  }
  0xba   : > { %v274_v23 = vpop.permute.xlu1 %273  ;;  %v284_v27 = vpop.permute.xlu0 %283 }
  0xbe   : > { %v269_v24 = vpop.permute.xlu1 %268  ;;  %v279_v42 = vpop.permute.xlu0 %278 }
  0xfd   : > { %v365_v25 = vpop.f32.mrf.mxu0  ;;  %v454_v26 = vpop.f32.mrf.mxu1 }
  0xfe   : > { %v1697_v28 = vadd.f32 %v365_v25, %v269_v24  ;;  %v1727_v58 = vadd.f32 %v454_v26, %v269_v24 }
  0xff   : > { %v367_v29 = vpop.f32.mrf.mxu0  ;;  %v456_v30 = vpop.f32.mrf.mxu1 }
 0x100   : > { %v1173_v31 = vmul.f32 -1.442695, %v1697_v28  ;;  %v1700_v32 = vadd.f32 %v367_v29, %v269_v24  ;;  %v1702_v33 = vadd.f32 %v456_v30, %v269_v24  ;;  %v1175_v9 = vmul.f32 -1.442695, %v1727_v58 }
 0x101   : > { %v371_v34 = vpop.f32.mrf.mxu0  ;;  %v460_v35 = vpop.f32.mrf.mxu1 }
 0x102   : > { %v1174_v36 = vmul.f32 -1.442695, %v1700_v32  ;;  %v1176_v37 = vmul.f32 -1.442695, %v1702_v33  ;;  %v1706_v38 = vadd.f32 %v371_v34, %v274_v23  ;;  %1275 = vpow2.f32 %v1173_v31 }
 0x103   : > { %v1708_v39 = vadd.f32 %v460_v35, %v274_v23  ;;  %v373_v40 = vpop.f32.mrf.mxu0  ;;  %v462_v41 = vpop.f32.mrf.mxu1 }
 0x104   : > { %1277 = vpow2.f32 %v1174_v36  ;;  %v1177_v43 = vmul.f32 -1.442695, %v1706_v38  ;;  %v1711_v44 = vadd.f32 %v373_v40, %v274_v23  ;;  %v1713_v45 = vadd.f32 %v462_v41, %v274_v23 }
 0x105   : > { %1279 = vpow2.f32 %v1176_v37  ;;  %v1179_v46 = vmul.f32 -1.442695, %v1708_v39  ;;  %v377_v47 = vpop.f32.mrf.mxu0  ;;  %v466_v48 = vpop.f32.mrf.mxu1 }
 0x106   : > { %1281 = vpow2.f32 %v1177_v43  ;;  %v1178_v49 = vmul.f32 -1.442695, %v1711_v44  ;;  %v1180_v50 = vmul.f32 -1.442695, %v1713_v45  ;;  %v1718_v51 = vadd.f32 %v377_v47, %v279_v42 }
 0x107   : > { %1283 = vpow2.f32 %v1179_v46  ;;  %v1720_v52 = vadd.f32 %v466_v48, %v279_v42  ;;  %v379_v53 = vpop.f32.mrf.mxu0  ;;  %v468_v54 = vpop.f32.mrf.mxu1 }
 0x108   : > { %1285 = vpow2.f32 %v1178_v49  ;;  %v1181_v55 = vmul.f32 -1.442695, %v1718_v51  ;;  %v1723_v56 = vadd.f32 %v379_v53, %v279_v42  ;;  %v1725_v57 = vadd.f32 %v468_v54, %v279_v42 }
 0x109   : > { %1287 = vpow2.f32 %v1180_v50  ;;  %v1183_v59 = vmul.f32 -1.442695, %v1720_v52  ;;  %v383_v60 = vpop.f32.mrf.mxu0  ;;  %v472_v61 = vpop.f32.mrf.mxu1 }
 0x10a   : > { %1289 = vpow2.f32 %v1181_v55  ;;  %v1182_v62 = vmul.f32 -1.442695, %v1723_v56  ;;  %v1184_v63 = vmul.f32 -1.442695, %v1725_v57  ;;  %v1732_v1 = vadd.f32 %v383_v60, %v284_v27 }
 0x10b   : > { %1291 = vpow2.f32 %v1183_v59  ;;  %v1734_v2 = vadd.f32 %v472_v61, %v284_v27  ;;  %v385_v3 = vpop.f32.mrf.mxu0  ;;  %v474_v4 = vpop.f32.mrf.mxu1 }
 0x10c   : > { %1293 = vpow2.f32 %v1182_v62  ;;  %v1185_v5 = vmul.f32 -1.442695, %v1732_v1  ;;  %v1737_v6 = vadd.f32 %v385_v3, %v284_v27  ;;  %v1739_v7 = vadd.f32 %v474_v4, %v284_v27 }
 0x10d   : > { %1295 = vpow2.f32 %v1184_v63  ;;  %v1187_v8 = vmul.f32 -1.442695, %v1734_v2 }
 0x10e   : > { %1297 = vpow2.f32 %v1185_v5  ;;  %v1186_v10 = vmul.f32 -1.442695, %v1737_v6  ;;  %v1188_v11 = vmul.f32 -1.442695, %v1739_v7 }
 0x10f   : > { %1299 = vpow2.f32 %v1187_v8  ;;  %v1276_v12 = vpop.eup %1275 }
 0x110   : > { %1301 = vpow2.f32 %v1186_v10  ;;  %v525_v16 = vadd.f32 1.0, %v1276_v12 }
 0x111   : > { %v1278_v13 = vpop.eup %1277  ;;  %1303 = vpow2.f32 %v1188_v11 }
 0x112   : > { %v1280_v14 = vpop.eup %1279  ;;  %1305 = vpow2.f32 %v1175_v9  ;;  %v526_v18 = vadd.f32 1.0, %v1278_v13 }
 0x113   : > { %v1282_v15 = vpop.eup %1281  ;;  %1307 = vrcp.f32 %v525_v16  ;;  %v528_v49 = vadd.f32 1.0, %v1280_v14 }
 0x114   : > { %v1284_v17 = vpop.eup %1283  ;;  %v529_v20 = vadd.f32 1.0, %v1282_v15  ;;  %1309 = vrcp.f32 %v526_v18 }
 0x115   : > { %v1286_v19 = vpop.eup %1285  ;;  %v531_v48 = vadd.f32 1.0, %v1284_v17 }
 0x116   : > { %v1288_v21 = vpop.eup %1287  ;;  %v530_v22 = vadd.f32 1.0, %v1286_v19  ;;  %1311 = vrcp.f32 %v529_v20 }
 0x117   : > { %v1290_v23 = vpop.eup %1289  ;;  %v532_v46 = vadd.f32 1.0, %v1288_v21 }
 0x118   : > { %v1292_v24 = vpop.eup %1291  ;;  %v533_v25 = vadd.f32 1.0, %v1290_v23  ;;  %1313 = vrcp.f32 %v530_v22 }
 0x119   : > { %v1294_v26 = vpop.eup %1293  ;;  %v535_v41 = vadd.f32 1.0, %v1292_v24 }
 0x11a   : > { %v1296_v27 = vpop.eup %1295  ;;  %v534_v29 = vadd.f32 1.0, %v1294_v26  ;;  %1315 = vrcp.f32 %v533_v25 }
 0x11b   : > { %v1298_v30 = vpop.eup %1297  ;;  %v536_v31 = vadd.f32 1.0, %v1296_v27 }
 0x11c   : > { %v1300_v34 = vpop.eup %1299  ;;  %1317 = vrcp.f32 %v534_v29  ;;  %v537_v35 = vadd.f32 1.0, %v1298_v30 }
 0x11d   : > { %v1302_v36 = vpop.eup %1301  ;;  %1319 = vrcp.f32 %v536_v31  ;;  %v539_v37 = vadd.f32 1.0, %v1300_v34 }
 0x11e   : > { %v1304_v40 = vpop.eup %1303  ;;  %1321 = vrcp.f32 %v537_v35  ;;  %v538_v42 = vadd.f32 1.0, %v1302_v36 }
 0x11f   : > { %v1306_v43 = vpop.eup %1305  ;;  %1323 = vrcp.f32 %v539_v37  ;;  %v540_v47 = vadd.f32 1.0, %v1304_v40 }
 0x120   : > { %1325 = vrcp.f32 %v538_v42  ;;  %v527_v50 = vadd.f32 1.0, %v1306_v43  ;;  %v1308_v53 = vpop.eup %1307 }
 0x121   : > { %1327 = vrcp.f32 %v540_v47  ;;  %v1310_v54 = vpop.eup %1309  ;;  %v573_v19 = vmul.f32 %v1308_v53, %v1697_v28  ;;  %v590_v28 = vld [vmem:[%s1901_s2 + $0x8] sm:$0xff] }
 0x122   : > { %1329 = vrcp.f32 %v535_v41 }
 0x123   : > { %1331 = vrcp.f32 %v532_v46  ;;  %v1312_v55 = vpop.eup %1311 }
 0x124   : > { %1333 = vrcp.f32 %v531_v48 }
 0x125   : > { %1335 = vrcp.f32 %v528_v49  ;;  %v1314_v59 = vpop.eup %1313 }
 0x126   : > { %1337 = vrcp.f32 %v527_v50 }
 0x127   : > { %v1316_v60 = vpop.eup %1315 }
 0x128   : > { %v581_v16 = vmul.f32 %v1316_v60, %v1718_v51  ;;  %v574_v51 = vmul.f32 %v1310_v54, %v1700_v32  ;;  %v591_v32 = vld [vmem:[%s1901_s2 + $0x10] sm:$0xff] }
 0x129   : > { %v1318_v61 = vpop.eup %1317 }
 0x12a   : > { %v1320_v62 = vpop.eup %1319  ;;  %v582_v13 = vmul.f32 %v1318_v61, %v1723_v56  ;;  %v577_v56 = vmul.f32 %v1312_v55, %v1706_v38  ;;  %v589_v38 = vld [vmem:[%s1901_s2] sm:$0xff] }
 0x12b   : > { %v1322_v63 = vpop.eup %1321  ;;  %v584_v17 = vmul.f32 %v1320_v62, %v1725_v57 }
 0x12c   : > { %v1324_v3 = vpop.eup %1323  ;;  %v585_v10 = vmul.f32 %v1322_v63, %v1732_v1 }
 0x12d   : > { %v1326_v4 = vpop.eup %1325  ;;  %v587_v14 = vmul.f32 %v1324_v3, %v1734_v2 }
 0x12e   : > { %v1328_v5 = vpop.eup %1327  ;;  %v586_v8 = vmul.f32 %v1326_v4, %v1737_v6  ;;  %v578_v6 = vmul.f32 %v1314_v59, %v1711_v44 }
 0x12f   : > { %v1330_v9 = vpop.eup %1329  ;;  %v588_v11 = vmul.f32 %v1328_v5, %v1739_v7 }
 0x130   : > { %v1332_v12 = vpop.eup %1331  ;;  %650 = vmatprep.subr.mxu0 %v586_v8  ;;  %v583_v1 = vmul.f32 %v1330_v9, %v1720_v52  ;;  %v611_v52 = vpop.permute.xlu0 %610 }
 0x131   : > { %v1334_v15 = vpop.eup %1333  ;;  %739 = vmatprep.subr.mxu1 %v588_v11  ;;  %651 = vmatpush1.msra.mxu0 %v585_v10  ;;  %v580_v2 = vmul.f32 %v1332_v12, %v1713_v45 }
 0x132   : > { %v1336_v18 = vpop.eup %1335  ;;  %740 = vmatpush1.msra.mxu1 %v587_v14  ;;  %652 = vmatprep.subr.mxu0 %v582_v13  ;;  %v579_v57 = vmul.f32 %v1334_v15, %v1708_v39  ;;  %v606_v39 = vpop.permute.xlu1 %605 }
 0x133   : > { %v1338_v7 = vpop.eup %1337  ;;  %741 = vmatprep.subr.mxu1 %v584_v17  ;;  %653 = vmatpush1.msra.mxu0 %v581_v16  ;;  %v576_v44 = vmul.f32 %v1336_v18, %v1702_v33  ;;  %v592_v33 = vld [vmem:[%s1901_s2 + $0x18] sm:$0xff] }
 0x134   : > { %742 = vmatpush1.msra.mxu1 %v583_v1  ;;  %654 = vmatprep.subr.mxu0 %v578_v6  ;;  %v575_v45 = vmul.f32 %v1338_v7, %v1727_v58  ;;  %v601_v27 = vpop.permute.xlu0 %600 }
 0x135   : > { %743 = vmatprep.subr.mxu1 %v580_v2  ;;  %655 = vmatpush1.msra.mxu0 %v577_v56 }
 0x136   : > { %744 = vmatpush1.msra.mxu1 %v579_v57  ;;  %656 = vmatprep.subr.mxu0 %v574_v51  ;;  %v596_v58 = vpop.permute.xlu1 %595 }
 0x137   : > { %745 = vmatprep.subr.mxu1 %v576_v44  ;;  %657 = vmatpush1.msra.mxu0 %v573_v19 }
 0x138   : > { %746 = vmatpush1.msra.mxu1 %v575_v45  ;;  %1189 = vmatmul.mubr.msk.f32.vlgmr.msra.gmra.mxu0 %vm613_vm1, %v589_v38 }
 0x139   : > { %1193 = vmatmul.mubr.msk.f32.vlgmr.msra.gmra.mxu1 %vm613_vm1, %v589_v38  ;;  %696 = vmatprep.mubr.f32.mxu0 %v1501_v0 }
 0x13a   : > { %785 = vmatprep.mubr.f32.mxu1 %v1501_v0 }
 0x13c   : > { %1190 = vmatmul.mubr.msk.f32.gmra.mxu0 %vm613_vm1, %v590_v28 }
 0x13d   : > { %1194 = vmatmul.mubr.msk.f32.gmra.mxu1 %vm613_vm1, %v590_v28  ;;  %702 = vmatprep.mubr.f32.mxu0 %v1501_v0 }
 0x13e   : > { %791 = vmatprep.mubr.f32.mxu1 %v1501_v0 }
 0x140   : > { %1191 = vmatmul.mubr.msk.f32.gmra.mxu0 %vm613_vm1, %v591_v32 }
 0x141   : > { %1195 = vmatmul.mubr.msk.f32.gmra.mxu1 %vm613_vm1, %v591_v32  ;;  %708 = vmatprep.mubr.f32.mxu0 %v1501_v0 }
 0x142   : > { %797 = vmatprep.mubr.f32.mxu1 %v1501_v0 }
 0x144   : > { %1192 = vmatmul.mubr.msk.f32.gmra.mxu0 %vm613_vm1, %v592_v33 }
 0x145   : > { %1196 = vmatmul.mubr.msk.f32.gmra.mxu1 %vm613_vm1, %v592_v33  ;;  %989 = vmatprep.mubr.f32.mxu0 %v1501_v0 }
 0x146   : > { %1060 = vmatprep.mubr.f32.mxu1 %v1501_v0 }
 0x1f8   : > { %v692_v20 = vpop.f32.mrf.mxu0 }
 0x1f9   : > { %v1789_v21 = vadd.f32 %v692_v20, %v596_v58  ;;  %v781_v22 = vpop.f32.mrf.mxu1 }
 0x1fa   : > { %v694_v23 = vpop.f32.mrf.mxu0  ;;  %v1820_v4 = vadd.f32 %v781_v22, %v596_v58 }
 0x1fb   : > { %v1197_v24 = vmul.f32 -1.442695, %v1789_v21  ;;  %v1792_v25 = vadd.f32 %v694_v23, %v596_v58  ;;  %v783_v26 = vpop.f32.mrf.mxu1 }
 0x1fc   : > { %v1794_v29 = vadd.f32 %v783_v26, %v596_v58  ;;  %v698_v30 = vpop.f32.mrf.mxu0  ;;  %v1199_v18 = vmul.f32 -1.442695, %v1820_v4 }
 0x1fd   : > { %v1198_v31 = vmul.f32 -1.442695, %v1792_v25  ;;  %v1797_v0 = vadd.f32 %v698_v30, %v601_v27  ;;  %v787_v34 = vpop.f32.mrf.mxu1  ;;  %1339 = vpow2.f32 %v1197_v24 }
 0x1fe   : > { %v1200_v35 = vmul.f32 -1.442695, %v1794_v29  ;;  %v1800_v36 = vadd.f32 %v787_v34, %v601_v27  ;;  %v700_v37 = vpop.f32.mrf.mxu0 }
 0x1ff   : > { %1341 = vpow2.f32 %v1198_v31  ;;  %v1201_v40 = vmul.f32 -1.442695, %v1797_v0  ;;  %v1803_v41 = vadd.f32 %v700_v37, %v601_v27  ;;  %v789_v42 = vpop.f32.mrf.mxu1 }
 0x200   : > { %1343 = vpow2.f32 %v1200_v35  ;;  %v1203_v43 = vmul.f32 -1.442695, %v1800_v36  ;;  %v1806_v46 = vadd.f32 %v789_v42, %v601_v27  ;;  %v704_v47 = vpop.f32.mrf.mxu0 }
 0x201   : > { %1345 = vpow2.f32 %v1201_v40  ;;  %v1202_v48 = vmul.f32 -1.442695, %v1803_v41  ;;  %v1809_v49 = vadd.f32 %v704_v47, %v606_v39  ;;  %v793_v50 = vpop.f32.mrf.mxu1 }
 0x202   : > { %1347 = vpow2.f32 %v1203_v43  ;;  %v1204_v53 = vmul.f32 -1.442695, %v1806_v46  ;;  %v1812_v54 = vadd.f32 %v793_v50, %v606_v39  ;;  %v706_v55 = vpop.f32.mrf.mxu0 }
 0x203   : > { %1349 = vpow2.f32 %v1202_v48  ;;  %v1205_v59 = vmul.f32 -1.442695, %v1809_v49  ;;  %v1815_v60 = vadd.f32 %v706_v55, %v606_v39  ;;  %v795_v61 = vpop.f32.mrf.mxu1 }
 0x204   : > { %1351 = vpow2.f32 %v1204_v53  ;;  %v1207_v62 = vmul.f32 -1.442695, %v1812_v54  ;;  %v1818_v63 = vadd.f32 %v795_v61, %v606_v39  ;;  %v710_v3 = vpop.f32.mrf.mxu0 }
 0x205   : > { %1353 = vpow2.f32 %v1205_v59  ;;  %v1206_v5 = vmul.f32 -1.442695, %v1815_v60  ;;  %v1823_v8 = vadd.f32 %v710_v3, %v611_v52  ;;  %v799_v9 = vpop.f32.mrf.mxu1 }
 0x206   : > { %1355 = vpow2.f32 %v1207_v62  ;;  %v1208_v10 = vmul.f32 -1.442695, %v1818_v63  ;;  %v1826_v11 = vadd.f32 %v799_v9, %v611_v52  ;;  %v712_v12 = vpop.f32.mrf.mxu0 }
 0x207   : > { %1357 = vpow2.f32 %v1206_v5  ;;  %v1209_v13 = vmul.f32 -1.442695, %v1823_v8  ;;  %v1829_v14 = vadd.f32 %v712_v12, %v611_v52  ;;  %v801_v15 = vpop.f32.mrf.mxu1 }
 0x208   : > { %1359 = vpow2.f32 %v1208_v10  ;;  %v1211_v16 = vmul.f32 -1.442695, %v1826_v11  ;;  %v1832_v17 = vadd.f32 %v801_v15, %v611_v52 }
 0x209   : > { %1361 = vpow2.f32 %v1209_v13  ;;  %v1210_v6 = vmul.f32 -1.442695, %v1829_v14 }
 0x20a   : > { %1363 = vpow2.f32 %v1211_v16  ;;  %v1212_v1 = vmul.f32 -1.442695, %v1832_v17  ;;  %v1340_v7 = vpop.eup %1339 }
 0x20b   : > { %1365 = vpow2.f32 %v1210_v6  ;;  %v852_v57 = vadd.f32 1.0, %v1340_v7 }
 0x20c   : > { %v1342_v56 = vpop.eup %1341  ;;  %1367 = vpow2.f32 %v1212_v1 }
 0x20d   : > { %v1344_v2 = vpop.eup %1343  ;;  %1369 = vpow2.f32 %v1199_v18  ;;  %v853_v44 = vadd.f32 1.0, %v1342_v56 }
 0x20e   : > { %v1346_v51 = vpop.eup %1345  ;;  %1371 = vrcp.f32 %v852_v57  ;;  %v855_v48 = vadd.f32 1.0, %v1344_v2 }
 0x20f   : > { %v1348_v19 = vpop.eup %1347  ;;  %v856_v45 = vadd.f32 1.0, %v1346_v51  ;;  %1373 = vrcp.f32 %v853_v44 }
 0x210   : > { %v1350_v38 = vpop.eup %1349  ;;  %v858_v47 = vadd.f32 1.0, %v1348_v19 }
 0x211   : > { %v1352_v28 = vpop.eup %1351  ;;  %v857_v32 = vadd.f32 1.0, %v1350_v38  ;;  %1375 = vrcp.f32 %v856_v45 }
 0x212   : > { %v1354_v33 = vpop.eup %1353  ;;  %v859_v42 = vadd.f32 1.0, %v1352_v28 }
 0x213   : > { %v1356_v39 = vpop.eup %1355  ;;  %v860_v52 = vadd.f32 1.0, %v1354_v33  ;;  %1377 = vrcp.f32 %v857_v32 }
 0x214   : > { %v1358_v58 = vpop.eup %1357  ;;  %v862_v35 = vadd.f32 1.0, %v1356_v39 }
 0x215   : > { %v1360_v20 = vpop.eup %1359  ;;  %v861_v22 = vadd.f32 1.0, %v1358_v58  ;;  %1379 = vrcp.f32 %v860_v52 }
 0x216   : > { %v1362_v23 = vpop.eup %1361  ;;  %v863_v24 = vadd.f32 1.0, %v1360_v20 }
 0x217   : > { %v1364_v26 = vpop.eup %1363  ;;  %1381 = vrcp.f32 %v861_v22  ;;  %v864_v27 = vadd.f32 1.0, %v1362_v23 }
 0x218   : > { %v1366_v30 = vpop.eup %1365  ;;  %1383 = vrcp.f32 %v863_v24  ;;  %v866_v31 = vadd.f32 1.0, %v1364_v26 }
 0x219   : > { %v1368_v34 = vpop.eup %1367  ;;  %1385 = vrcp.f32 %v864_v27  ;;  %v865_v37 = vadd.f32 1.0, %v1366_v30 }
 0x21a   : > { %v1370_v40 = vpop.eup %1369  ;;  %1387 = vrcp.f32 %v866_v31  ;;  %v867_v43 = vadd.f32 1.0, %v1368_v34 }
 0x21b   : > { %1389 = vrcp.f32 %v865_v37  ;;  %v854_v50 = vadd.f32 1.0, %v1370_v40  ;;  %v1372_v53 = vpop.eup %1371 }
 0x21c   : > { %1391 = vrcp.f32 %v867_v43  ;;  %v1374_v55 = vpop.eup %1373 }
 0x21d   : > { %1393 = vrcp.f32 %v862_v35 }
 0x21e   : > { %1395 = vrcp.f32 %v859_v42  ;;  %v1376_v59 = vpop.eup %1375 }
 0x21f   : > { %1397 = vrcp.f32 %v858_v47 }
 0x220   : > { %1399 = vrcp.f32 %v855_v48  ;;  %v1378_v61 = vpop.eup %1377 }
 0x221   : > { %1401 = vrcp.f32 %v854_v50 }
 0x222   : > { %v1380_v62 = vpop.eup %1379 }
 0x223   : > { %v908_v51 = vmul.f32 %v1380_v62, %v1809_v49  ;;  %v901_v49 = vmul.f32 %v1374_v55, %v1792_v25 }
 0x224   : > { %v1382_v3 = vpop.eup %1381 }
 0x225   : > { %v1384_v5 = vpop.eup %1383  ;;  %v909_v7 = vmul.f32 %v1382_v3, %v1815_v60  ;;  %v904_v60 = vmul.f32 %v1376_v59, %v1797_v0  ;;  %v916_v0 = vld [vmem:[%s1902_s3] sm:$0xff] }
 0x226   : > { %v1386_v9 = vpop.eup %1385  ;;  %v911_v57 = vmul.f32 %v1384_v5, %v1818_v63 }
 0x227   : > { %v1388_v10 = vpop.eup %1387  ;;  %v912_v18 = vmul.f32 %v1386_v9, %v1823_v8 }
 0x228   : > { %v1390_v12 = vpop.eup %1389  ;;  %v914_v56 = vmul.f32 %v1388_v10, %v1826_v11 }
 0x229   : > { %v1392_v13 = vpop.eup %1391  ;;  %v913_v15 = vmul.f32 %v1390_v12, %v1829_v14  ;;  %v905_v14 = vmul.f32 %v1378_v61, %v1803_v41  ;;  %v900_v41 = vmul.f32 %v1372_v53, %v1789_v21  ;;  %v920_v21 = vpop.permute.xlu0 %919 }
 0x22a   : > { %v1394_v16 = vpop.eup %1393  ;;  %v915_v6 = vmul.f32 %v1392_v13, %v1832_v17 }
 0x22b   : > { %v1396_v1 = vpop.eup %1395  ;;  %949 = vmatprep.subr.mxu0 %v913_v15  ;;  %v910_v8 = vmul.f32 %v1394_v16, %v1812_v54 }
 0x22c   : > { %v1398_v2 = vpop.eup %1397  ;;  %1020 = vmatprep.subr.mxu1 %v915_v6  ;;  %950 = vmatpush1.msra.mxu0 %v912_v18  ;;  %v907_v11 = vmul.f32 %v1396_v1, %v1806_v46 }
 0x22d   : > { %v1400_v19 = vpop.eup %1399  ;;  %1021 = vmatpush1.msra.mxu1 %v914_v56  ;;  %951 = vmatprep.subr.mxu0 %v909_v7  ;;  %v906_v63 = vmul.f32 %v1398_v2, %v1800_v36 }
 0x22e   : > { %v1402_v17 = vpop.eup %1401  ;;  %1022 = vmatprep.subr.mxu1 %v911_v57  ;;  %952 = vmatpush1.msra.mxu0 %v908_v51  ;;  %v903_v54 = vmul.f32 %v1400_v19, %v1794_v29 }
 0x22f   : > { %1023 = vmatpush1.msra.mxu1 %v910_v8  ;;  %953 = vmatprep.subr.mxu0 %v905_v14  ;;  %v902_v46 = vmul.f32 %v1402_v17, %v1820_v4 }
 0x230   : > { %1024 = vmatprep.subr.mxu1 %v907_v11  ;;  %954 = vmatpush1.msra.mxu0 %v904_v60 }
 0x231   : > { %1025 = vmatpush1.msra.mxu1 %v906_v63  ;;  %955 = vmatprep.subr.mxu0 %v901_v49 }
 0x232   : > { %1026 = vmatprep.subr.mxu1 %v903_v54  ;;  %956 = vmatpush1.msra.mxu0 %v900_v41 }
 0x233   : > { %1027 = vmatpush1.msra.mxu1 %v902_v46  ;;  %1213 = vmatmul.mubr.msk.f32.vlgmr.msra.gmra.mxu0 %vm613_vm1, %v916_v0 }
 0x234   : > { %1214 = vmatmul.mubr.msk.f32.vlgmr.msra.gmra.mxu1 %vm613_vm1, %v916_v0 }
 0x2f3   : > { %v991_v25 = vpop.f32.mrf.mxu0 }
 0x2f4   : > { %v992_v29 = vadd.f32 %v991_v25, %v920_v21  ;;  %v1062_v36 = vpop.f32.mrf.mxu1 }
 0x2f5   : > { %v1063_v4 = vadd.f32 %v1062_v36, %v920_v21  ;;  %v993_v44 = vpop.f32.mrf.mxu0 }
 0x2f6   : > { %1067 = vst [vmem:[%s242_s11] sm:$0xff] %v992_v29  ;;  %v994_v38 = vadd.f32 %v993_v44, %v920_v21  ;;  %v1064_v45 = vpop.f32.mrf.mxu1 }
 0x2f7   : > { %1069 = vst [vmem:[%s242_s11 + $0x10] sm:$0xff] %v1063_v4  ;;  %v1065_v28 = vadd.f32 %v1064_v45, %v920_v21 }
 0x2f8   : > { %1068 = vst [vmem:[%s242_s11 + $0x8] sm:$0xff] %v994_v38 }
 0x2f9   : > { %1070 = vst [vmem:[%s242_s11 + $0x18] sm:$0xff] %v1065_v28 }
 0x2fa   : > { %1444 = shalt.err (!%p1441_p9)
}
 0x2fb   : > { %s1445_s14 = scalar_lea.hbm %s1863_s26, 512  ;;  %s1449_s16 = scalar_lea.hbm %s1904_s5, 1536 }
 0x2fc   : > { %p1446_p0 = scmp.ne.s32.totalorder %s1863_s26, %s1445_s14  ;;  %p1450_p1 = scmp.lt.s32.totalorder %s1863_s26, %s1904_s5 }
 0x2fd   : > { %p1451_p3 = scmp.lt.s32.totalorder %s1449_s16, %s1445_s14 }
 0x2fe   : > { %p1447_p2 = pnand %p1446_p0, %p1914_p11 }
 0x2ff   : > { %p1452_p6 = por %p1451_p3, %p1450_p1 }
 0x300   : > { %p1448_p13 = pneg %p1447_p2 }
 0x302   : > { %p1453_p10 = pnand %p1452_p6, %p1448_p13 }
 0x304   : > { %1456 = shalt.err (!%p1453_p10)
}
 0x305   : > { %1224 = dma.vmem_to_hbm [thread:$0]  (%p1914_p11), %s1087_s13, 512, %s1863_s26, %s1072_s28  }
 0x306 PF: > { %p1235_p12 = scmp.ge.s32.totalorder %s1495_s21, 2  ;;  %s1098_s10 = sand.u32 1, %s1483_s18  }
 0x307   : > { %p1915_p4 = scmp.ne.s32.totalorder %s1910_s6, 0  ;;  %s1099_s11 = scalar_lea.sflag [#allocation4], %s1098_s10 }
 0x309   : > { %p1231_p5 = pnand %p1235_p12, %p1915_p4 }
 0x30b   : > { %p1232_p7 = pneg %p1231_p5 }
 0x30d   : > { %1478 = dma.done.wait (%p1232_p7), %s1099_s11, 512  }
 0x30e   : > { %1480 = vsyncadd (%p1232_p7), %s1099_s11, 4294966784  ;;  %p18_p8 = scmp.ge.s32.totalorder %s1559_s24, 5   ;;  %s1916_s18 = smov %s1487_s19 }
 0x30f   : > { %s1917_s19 = smov %s1491_s20  ;;  %s1918_s20 = smov %s1571_s27 }
 0x310   : > { %s1919_s21 = smov %s1559_s24  ;;  %20 = sbr.rel (!%p18_p8) target bundleno = 5 (0x5), region = 85 }
 0x315   :  { %1104 = vsyncpa [#allocation3], 1 }
 0x316   :  { %1106 = vsyncpa [#allocation3 + $0x1], 1 }
 0x317   :  { %1107 = vsyncpa [#allocation4], 1 }
 0x318   :  { %1109 = vsyncpa [#allocation4 + $0x1], 1 }

</bundles_post_ra>
